<compile_context>
chip_gen: v7x
topology: tpu7x:2x2x1
jax: 0.10.0
libtpu: 0.0.40
codegen_flags: <defaults>
</compile_context>

<pallas_src>
import functools
import math

import jax
import jax.numpy as jnp
from jax import lax
from jax.experimental import pallas as pl
from jax.experimental.pallas import tpu as pltpu


def _cosface_kernel(x_ref, w_ref, label_ref, o_ref, wn_ref, *, s, m, block_c):
    """Compute one (TB, TC) tile of s * (normalize(x) @ normalize(W).T - m*one_hot).

    Grid = (C_tiles, B_tiles): axis 0 (outer) walks class tiles, axis 1 (inner)
    walks batch tiles, so the W tile stays resident in VMEM across all batch
    tiles and is normalized only on the first batch step of each class tile.
    """
    b_idx = pl.program_id(1)

    # Normalize the W tile once per class tile, cache in VMEM scratch.
    @pl.when(b_idx == 0)
    def _():
        w = w_ref[...].astype(jnp.float32)                               # (TC, D)
        w_inv = lax.rsqrt(jnp.maximum(jnp.sum(w * w, axis=-1, keepdims=True), 1e-24))
        wn_ref[...] = (w * w_inv).astype(wn_ref.dtype)

    # Normalize the x tile (f32 accumulation; MXU operands keep the input dtype).
    x = x_ref[...].astype(jnp.float32)                                   # (TB, D)
    x_inv = lax.rsqrt(jnp.maximum(jnp.sum(x * x, axis=-1, keepdims=True), 1e-24))
    xn = (x * x_inv).astype(x_ref.dtype)

    # cosine = xn @ wn.T via dot_general contracting the last (feature) dims:
    # no transpose of the (TC, D) tile, the MXU is fed in-place.
    cosine = lax.dot_general(
        xn, wn_ref[...],
        dimension_numbers=(((1,), (1,)), ((), ())),
        preferred_element_type=jnp.float32,
    )                                                                    # (TB, TC)

    # One-hot margin: global class ids of this C tile vs labels of this B tile,
    # with s*m folded into the select (no full-tile one_hot*m multiply).
    labels = label_ref[...]                                              # (TB, 1) int32
    class_ids = (lax.broadcasted_iota(jnp.int32, cosine.shape, 1)
                 + pl.program_id(0) * block_c)
    scaled = cosine * s
    o_ref[...] = jnp.where(class_ids == labels, scaled - (s * m), scaled).astype(
        o_ref.dtype)


def cosine_margin_product(x, weight, label, *, s=30.0, m=0.2,
                          block_b=256, block_c=1024):
    """x: (B, D), weight: (C, D), label: (B,) int -> (B, C) float32."""
    B, D = x.shape
    C, Dw = weight.shape
    assert D == Dw

    # Tile sizes: full dim when small, else the requested (8/128-aligned) tile;
    # pad arrays so the grid divides evenly (padding sliced off at the end).
    tb = B if B <= block_b else block_b
    tc = C if C <= block_c else block_c
    Bp = pl.cdiv(B, tb) * tb
    Cp = pl.cdiv(C, tc) * tc

    xp = x if Bp == B else jnp.pad(x, ((0, Bp - B), (0, 0)))
    wp = weight if Cp == C else jnp.pad(weight, ((0, Cp - C), (0, 0)))
    lp = label.astype(jnp.int32)
    if Bp != B:
        lp = jnp.pad(lp, (0, Bp - B), constant_values=-1)
    lp = lp.reshape(Bp, 1)

    grid = (Cp // tc, Bp // tb)  # C outer, B inner -> each W tile read once.

    kernel = functools.partial(_cosface_kernel, s=float(s), m=float(m), block_c=tc)
    out = pl.pallas_call(
        kernel,
        out_shape=jax.ShapeDtypeStruct((Bp, Cp), jnp.float32),
        grid_spec=pltpu.PrefetchScalarGridSpec(
            num_scalar_prefetch=0,
            grid=grid,
            in_specs=[
                pl.BlockSpec((tb, D), lambda c, b: (b, 0)),   # x tile (inner axis)
                pl.BlockSpec((tc, D), lambda c, b: (c, 0)),   # W tile (outer axis only)
                pl.BlockSpec((tb, 1), lambda c, b: (b, 0)),   # labels for this B tile
            ],
            out_specs=pl.BlockSpec((tb, tc), lambda c, b: (b, c)),
            scratch_shapes=[pltpu.VMEM((tc, D), weight.dtype)],  # normalized W cache
        ),
        compiler_params=pltpu.CompilerParams(
            dimension_semantics=("parallel", "arbitrary"),
            vmem_limit_bytes=48 * 1024 * 1024,  # fits v7x's 64 MiB with headroom
        ),
        cost_estimate=pl.CostEstimate(
            flops=2 * Bp * Cp * D,
            transcendentals=Bp + Cp,
            bytes_accessed=(xp.size * xp.dtype.itemsize
                            + wp.size * wp.dtype.itemsize
                            + Bp * Cp * 4 + lp.size * 4),
        ),
    )(xp, wp, lp)

    return out[:B, :C]


def _reference(x, weight, label, *, s=30.0, m=0.2):
    xn = x / jnp.maximum(jnp.linalg.norm(x, axis=1, keepdims=True), 1e-12)
    wn = weight / jnp.maximum(jnp.linalg.norm(weight, axis=1, keepdims=True), 1e-12)
    cosine = xn @ wn.T
    one_hot = jax.nn.one_hot(label, weight.shape[0], dtype=cosine.dtype)
    return s * (cosine - one_hot * m)


if __name__ == "__main__":
    key = jax.random.PRNGKey(0)
    s, m = 30.0, 0.2

    # --- Test 1: module-sized toy shape (single-tile grid) ---------------------
    k_x, k_w, k_l = jax.random.split(key, 3)
    B, in_features, out_features = 8, 32, 16
    bound = math.sqrt(6.0 / (in_features + out_features))  # xavier_uniform_
    weight = jax.random.uniform(
        k_w, (out_features, in_features), jnp.float32, minval=-bound, maxval=bound)
    x = jax.random.normal(k_x, (B, in_features), jnp.float32)
    label = jax.random.randint(k_l, (B,), 0, out_features, dtype=jnp.int32)

    out = jax.block_until_ready(cosine_margin_product(x, weight, label, s=s, m=m))
    ref = _reference(x, weight, label, s=s, m=m)
    assert out.shape == (B, out_features)
    assert jnp.allclose(out, ref, atol=1e-3, rtol=1e-3), "mismatch vs reference (test 1)"

    # --- Test 2: exercises the real 2-D grid (C outer, B inner) ----------------
    k_x2, k_w2, k_l2 = jax.random.split(jax.random.PRNGKey(1), 3)
    B2, D2, C2 = 32, 128, 256
    bound2 = math.sqrt(6.0 / (D2 + C2))
    weight2 = jax.random.uniform(k_w2, (C2, D2), jnp.float32, minval=-bound2, maxval=bound2)
    x2 = jax.random.normal(k_x2, (B2, D2), jnp.float32)
    label2 = jax.random.randint(k_l2, (B2,), 0, C2, dtype=jnp.int32)

    out2 = jax.block_until_ready(
        cosine_margin_product(x2, weight2, label2, s=s, m=m, block_b=8, block_c=128))
    ref2 = _reference(x2, weight2, label2, s=s, m=m)
    assert out2.shape == (B2, C2)
    assert jnp.allclose(out2, ref2, atol=1e-3, rtol=1e-3), "mismatch vs reference (test 2)"

    print("KERNEL_OK")
</pallas_src>

<mosaic_0001>
module attributes {stable_mosaic.version = 11 : i64} {
  func.func @_cosface_kernel(%arg0: i32, %arg1: i32, %arg2: memref<8x32xf32, #tpu.memory_space<vmem>>, %arg3: memref<16x32xf32, #tpu.memory_space<vmem>>, %arg4: memref<8x1xi32, #tpu.memory_space<vmem>>, %arg5: memref<8x16xf32, #tpu.memory_space<vmem>>, %arg6: memref<16x32xf32, #tpu.memory_space<vmem>>) attributes {dimension_semantics = [#tpu.dimension_semantics<parallel>, #tpu.dimension_semantics<arbitrary>], iteration_bounds = array<i64: 1, 1>, scalar_prefetch = 0 : i64, scratch_operands = 1 : i64, tpu.core_type = #tpu.core_type<tc>, window_params = [{transform_indices = @transform_0, window_bounds = array<i64: 8, 32>}, {transform_indices = @transform_1, window_bounds = array<i64: 16, 32>}, {transform_indices = @transform_2, window_bounds = array<i64: 8, 1>}, {transform_indices = @transform_3, window_bounds = array<i64: 8, 16>}]} {
    %c0_i32 = arith.constant 0 : i32
    %0 = arith.cmpi eq, %arg1, %c0_i32 : i32
    %1 = arith.extui %0 : i1 to i32
    %c0_i32_0 = arith.constant 0 : i32
    %2 = arith.cmpi ne, %1, %c0_i32_0 : i32
    scf.if %2 {
      %c0_12 = arith.constant 0 : index
      %c0_13 = arith.constant 0 : index
      %27 = vector.load %arg3[%c0_12, %c0_13] : memref<16x32xf32, #tpu.memory_space<vmem>>, vector<16x32xf32>
      %28 = arith.mulf %27, %27 : vector<16x32xf32>
      %cst_14 = arith.constant dense<0.000000e+00> : vector<16xf32>
      %29 = vector.multi_reduction <add>, %28, %cst_14 [1] : vector<16x32xf32> to vector<16xf32>
      %30 = vector.shape_cast %29 : vector<16xf32> to vector<16x1xf32>
      %cst_15 = arith.constant 1.000000e-24 : f32
      %31 = vector.broadcast %cst_15 : f32 to vector<16x1xf32>
      %32 = arith.maximumf %30, %31 : vector<16x1xf32>
      %33 = math.rsqrt %32 : vector<16x1xf32>
      %34 = vector.broadcast %33 : vector<16x1xf32> to vector<16x32xf32>
      %35 = arith.mulf %27, %34 : vector<16x32xf32>
      %c0_16 = arith.constant 0 : index
      %c0_17 = arith.constant 0 : index
      %36 = vector.load %arg6[%c0_16, %c0_17] : memref<16x32xf32, #tpu.memory_space<vmem>>, vector<16x32xf32>
      tpu.vector_store %arg6[%c0_16, %c0_17], %35 {strides = array<i32>} : memref<16x32xf32, #tpu.memory_space<vmem>>, vector<16x32xf32>,
    } else {
    }
    %c0 = arith.constant 0 : index
    %c0_1 = arith.constant 0 : index
    %3 = vector.load %arg2[%c0, %c0_1] : memref<8x32xf32, #tpu.memory_space<vmem>>, vector<8x32xf32>
    %4 = arith.mulf %3, %3 : vector<8x32xf32>
    %cst = arith.constant dense<0.000000e+00> : vector<8xf32>
    %5 = vector.multi_reduction <add>, %4, %cst [1] : vector<8x32xf32> to vector<8xf32>
    %6 = vector.shape_cast %5 : vector<8xf32> to vector<8x1xf32>
    %cst_2 = arith.constant 1.000000e-24 : f32
    %7 = vector.broadcast %cst_2 : f32 to vector<8x1xf32>
    %8 = arith.maximumf %6, %7 : vector<8x1xf32>
    %9 = math.rsqrt %8 : vector<8x1xf32>
    %10 = vector.broadcast %9 : vector<8x1xf32> to vector<8x32xf32>
    %11 = arith.mulf %3, %10 : vector<8x32xf32>
    %c0_3 = arith.constant 0 : index
    %c0_4 = arith.constant 0 : index
    %12 = vector.load %arg6[%c0_3, %c0_4] : memref<16x32xf32, #tpu.memory_space<vmem>>, vector<16x32xf32>
    %cst_5 = arith.constant dense<0.000000e+00> : vector<8x16xf32>
    %13 = tpu.matmul %11, %12, %cst_5 {dimension_numbers = #tpu.dot_dimension_numbers<[1], [1], [0], [0], [0, 0, 1, 0], [], []>} : vector<8x32xf32>, vector<16x32xf32>, vector<8x16xf32> -> vector<8x16xf32>
    %c0_6 = arith.constant 0 : index
    %c0_7 = arith.constant 0 : index
    %14 = vector.load %arg4[%c0_6, %c0_7] : memref<8x1xi32, #tpu.memory_space<vmem>>, vector<8x1xi32>
    %15 = tpu.iota {dimensions = array<i32: 1>} : vector<8x16xi32>
    %c16_i32 = arith.constant 16 : i32
    %16 = arith.muli %arg0, %c16_i32 : i32
    %17 = vector.broadcast %16 : i32 to vector<8x16xi32>
    %18 = arith.addi %15, %17 : vector<8x16xi32>
    %cst_8 = arith.constant 3.000000e+01 : f32
    %19 = vector.broadcast %cst_8 : f32 to vector<8x16xf32>
    %20 = arith.mulf %13, %19 : vector<8x16xf32>
    %21 = vector.broadcast %14 : vector<8x1xi32> to vector<8x16xi32>
    %22 = arith.cmpi eq, %18, %21 : vector<8x16xi32>
    %cst_9 = arith.constant 6.000000e+00 : f32
    %23 = vector.broadcast %cst_9 : f32 to vector<8x16xf32>
    %24 = arith.subf %20, %23 : vector<8x16xf32>
    %25 = arith.select %22, %24, %20 : vector<8x16xi1>, vector<8x16xf32>
    %c0_10 = arith.constant 0 : index
    %c0_11 = arith.constant 0 : index
    %26 = vector.load %arg5[%c0_10, %c0_11] : memref<8x16xf32, #tpu.memory_space<vmem>>, vector<8x16xf32>
    tpu.vector_store %arg5[%c0_10, %c0_11], %25 {strides = array<i32>} : memref<8x16xf32, #tpu.memory_space<vmem>>, vector<8x16xf32>,
    return
  }
  func.func @transform_0(%arg0: i32, %arg1: i32) -> (i32, i32) {
    %c0_i32 = arith.constant 0 : i32
    %c0_i32_0 = arith.constant 0 : i32
    return %arg1, %c0_i32 : i32, i32
  }
  func.func @transform_1(%arg0: i32, %arg1: i32) -> (i32, i32) {
    %c0_i32 = arith.constant 0 : i32
    %c0_i32_0 = arith.constant 0 : i32
    return %arg0, %c0_i32 : i32, i32
  }
  func.func @transform_2(%arg0: i32, %arg1: i32) -> (i32, i32) {
    %c0_i32 = arith.constant 0 : i32
    %c0_i32_0 = arith.constant 0 : i32
    return %arg1, %c0_i32 : i32, i32
  }
  func.func @transform_3(%arg0: i32, %arg1: i32) -> (i32, i32) {
    %c0_i32 = arith.constant 0 : i32
    return %arg1, %arg0 : i32, i32
  }
}

</mosaic_0001>

<bundles_post_ra>
// kernel: tpu_custom_call.1
= control target key start
LH: loop header
LB: loop body
LE: loop exit
PB: predicated region body
PF: predicated region fallthrough
CT: control target
= control target key end

     0   :  { %8 = vsyncpa [#allocation4], 0  ;;  %s320_s0 = inlined_call_operand.vmem [shape: f32[8,32], index: 0, kind: input, shape index: {}]   ;;  %s321_s1 = inlined_call_operand.hbm [shape: f32[16,32], index: 1, kind: input, shape index: {}]   ;;  %s322_s2 = inlined_call_operand.vmem [shape: s32[8,1], index: 2, kind: input, shape index: {}]   ;;  %s323_s3 = inlined_call_operand.hbm [shape: f32[8,16], index: 3, kind: output, shape index: {}]  }
   0x1   :  { %9 = vsyncpa [#allocation5], 0  ;;  %s254_s12 = smov [#allocation3]   ;;  %s206_s16 = scalar_lea.hbm %s321_s1, 256 }
   0x2   :  { %s17_s13 = sshll.u32 %s254_s12, 4  ;;  %p207_p0 = scmp.ne.s32.totalorder %s321_s1, %s206_s16  ;;  %s18_s13 = int_to_ptr.vmem [resolvable:$true] %s17_s13 }
   0x3   :  { %p210_p1 = scmp.lt.u32.totalorder %s206_s16, %s321_s1 }
   0x5   :  { %p212_p2 = pnand %p210_p1, %p207_p0 }
   0x7   :  { %215 = shalt.err (!%p212_p2)
}
   0x8   :  { %s216_s21 = scalar_lea.vmem %s18_s13, 256  ;;  %p221_p4 = scmp.lt.s32.totalorder %s18_s13, %s18_s13 }
   0x9   :  { %p217_p3 = scmp.ne.s32.totalorder %s18_s13, %s216_s21  ;;  %p222_p5 = scmp.lt.s32.totalorder %s216_s21, %s216_s21 }
   0xb   :  { %p223_p6 = por %p222_p5, %p221_p4 }
   0xd   :  { %p224_p7 = pnand %p223_p6, %p217_p3 }
   0xf   :  { %227 = shalt.err (!%p224_p7)
}
  0x10   :  { %s255_s22 = smov 128   ;;  %s256_s23 = smov 8  }
  0x11   :  { %23 = dma.hbm_to_vmem [thread:$0]  %s321_s1, 256, %s18_s13, [#allocation4], %s255_s22, %s255_s22, %s256_s23  }
  0x12   :  { %250 = dma.done.wait [#allocation4], 256  }
  0x13   :  { %251 = vsyncadd [#allocation4], 4294967040  ;;  %v33_v0 = vld [vmem:[#allocation3] sm:$0xff]  ;;  %vm37_vm0 = vcmask 261120   ;;  %v34_v1 = vld [vmem:[#allocation3 + $0x8] sm:$0xff]  ;;  %v257_v9 = vmov 0.0|0.0   ;;  %v143_v28 = vlaneseq }
  0x14   :  { %v52_v2 = vld [vmem:[%s320_s0] sm:$0xff]  ;;  %v35_v3 = vmul.f32 %v33_v0, %v33_v0  ;;  %v36_v4 = vmul.f32 %v34_v1, %v34_v1  ;;  %186 = vmatprep.subr.bf16.mxu0 %v257_v9  ;;  %vm258_vm1 = vmmov 0   ;;  %v259_v10 = vmov 0.0   ;;  %vm188_vm2 = vmpackc.low %vm37_vm0, %vm37_vm0  ;;  %s261_s0 = smov [#allocation6]  }
  0x15   :  { %v53_v5 = vmul.f32 %v52_v2, %v52_v2  ;;  %183 = vmatprep.mubr.msk.f32.mxu0 %vm258_vm1, %v259_v10  ;;  %v142_v11 = vld [vmem:[%s322_s2] sm:$0xff]  ;;  %v260_v12 = vmov 0   ;;  %v144_v29 = vand.u32 127, %v143_v28  ;;  %s163_s2 = sshll.u32 %s261_s0, 4  ;;  %vm155_vm4 = vcmask 130048   ;;  %s164_s2 = int_to_ptr.vmem [resolvable:$true] %s163_s2 }
  0x16   :  { %v38_v6 = vsel %vm37_vm0, %v35_v3, 0.0  ;;  %v41_v8 = vsel %vm37_vm0, %v36_v4, 0.0  ;;  %198 = vset.pattern.permute.xlu1 %v260_v12  ;;  %199 = vset.pattern.permute.xlu0 %v260_v12  ;;  %s228_s29 = scalar_lea.vmem %s164_s2, 128  ;;  %p233_p9 = scmp.lt.s32.totalorder %s164_s2, %s164_s2 }
  0x17   :  { %v55_v7 = vsel %vm37_vm0, %v53_v5, 0.0  ;;  %39 = vadd.xlane.f32.xlu0 %v38_v6  ;;  %p229_p8 = scmp.ne.s32.totalorder %s164_s2, %s228_s29  ;;  %p234_p10 = scmp.lt.s32.totalorder %s228_s29, %s228_s29 }
  0x18   :  { %56 = vadd.xlane.f32.xlu1 %v55_v7 }
  0x19   :  { %p235_p11 = por %p234_p10, %p233_p9 }
  0x1b   :  { %42 = vadd.xlane.f32.xlu0 %v41_v8  ;;  %p236_p12 = pnand %p235_p11, %p229_p8 }
  0x29   :  { %150 = vperm.xlu1 %198, %v142_v11  }
  0xa4   :  { %v40_v13 = vpop.xlane.xlu0 %39 }
  0xa5   :  { %v44_v14 = vmax.f32 %v40_v13, 1e-24  ;;  %v57_v18 = vpop.xlane.xlu1 %56 }
  0xa6   :  { %v58_v20 = vmax.f32 %v57_v18, 1e-24 }
  0xa7   :  { %200 = vrsqrt.f32 %v44_v14 }
  0xa8   :  { %v43_v15 = vpop.xlane.xlu0 %42 }
  0xa9   :  { %v45_v16 = vmax.f32 %v43_v15, 1e-24  ;;  %v151_v30 = vpop.permute.xlu1 %150 }
  0xaa   :  { %vm152_vm3 = vcmp.eq.s32.totalorder %v144_v29, %v151_v30 }
  0xab   :  { %202 = vrsqrt.f32 %v45_v16 }
  0xac   :  { %204 = vrsqrt.f32 %v58_v20 }
  0xb1   :  { %v201_v17 = vpop.eup %200 }
  0xb2   :  { %v48_v19 = vmul.f32 %v201_v17, %v33_v0 }
  0xb4   :  { %50 = vst.msk [vmem:[#allocation2] sm:$0xff] %vm37_vm0, %v48_v19 }
  0xb5   :  { %v203_v21 = vpop.eup %202 }
  0xb6   :  { %v49_v22 = vmul.f32 %v203_v21, %v34_v1  ;;  %v205_v26 = vpop.eup %204 }
  0xb7   :  { %v60_v27 = vmul.f32 %v205_v26, %v52_v2 }
  0xb8   :  { %51 = vst.msk [vmem:[#allocation2 + $0x8] sm:$0xff] %vm37_vm0, %v49_v22 }
  0xbb   :  { %v61_v23 = vld [vmem:[#allocation2] sm:$0xff] }
  0xbf   :  { %v62_v24 = vld [vmem:[#allocation2 + $0x8] sm:$0xff] }
  0xc0   :  { %v187_v25 = vpack.c.bf16 %v62_v24, %v61_v23 }
  0xc2   :  { %189 = vmatpush3.bf16.xpose.msk.msra.mxu0 %vm188_vm2, %v187_v25 }
  0xc9   :  { %184 = vmatmul.mubr.msk.f32.vlgmr.msra.gmra.mrb[0].mxu0 %vm37_vm0, %v60_v27 }
 0x19c   :  { %v138_v31 = vpop.f32.mrb[0].mxu0 }
 0x19d   :  { %v148_v32 = vmul.f32 30.0, %v138_v31  ;;  %v185_v33 = vpop.f32.mrb[1].mxu0 }
 0x19f   :  { %v175_v34 = vadd.f32 -6.0, %v148_v32 }
 0x1a1   :  { %v154_v35 = vsel %vm152_vm3, %v175_v34, %v148_v32 }
 0x1a2   :  { %156 = vst.msk [vmem:[#allocation6] sm:$0xff] %vm155_vm4, %v154_v35 }
 0x1a3   :  { %239 = shalt.err (!%p236_p12)
}
 0x1a4   :  { %s240_s5 = scalar_lea.hbm %s323_s3, 128 }
 0x1a5   :  { %p241_p13 = scmp.ne.s32.totalorder %s323_s3, %s240_s5  ;;  %p244_p0 = scmp.lt.u32.totalorder %s240_s5, %s323_s3 }
 0x1a7   :  { %p246_p1 = pnand %p244_p0, %p241_p13 }
 0x1a9   :  { %249 = shalt.err (!%p246_p1)
}
 0x1aa   :  { %166 = dma.vmem_to_hbm [thread:$0]  %s164_s2, 128, %s323_s3, [#allocation5]  }
 0x1ab   :  { %252 = dma.done.wait [#allocation5], 128  }
 0x1ac   :  { %253 = vsyncadd [#allocation5], 4294967168 }
 0x1ad   :  { %170 = vsyncpa [#allocation4], 1 }
 0x1ae   :  { %171 = vsyncpa [#allocation5], 1 }

</bundles_post_ra>
